<compile_context>
chip_gen: v7x
topology: tpu7x:2x2x1
jax: 0.10.0
libtpu: 0.0.40
codegen_flags: <defaults>
</compile_context>

<pallas_src>
import functools
import jax
import jax.numpy as jnp
from jax.experimental import pallas as pl
from jax.experimental.pallas import tpu as pltpu


def gaussian_mlp_kernel(xt_ref, w0t_ref, b0_ref, w1t_ref, b1_ref, out_ref,
                        *, n_outputs, use_tanh):
    """Two MXU matmuls + relu + sublane-selected (mean | softplus-variance) epilogue.

    All tensors are in the transposed, batch-in-lanes layout:
      xt_ref  : [D_in, TB]        w0t_ref : [H, D_in]       b0_ref : [H, 1]
      w1t_ref : [2*out, H]        b1_ref  : [2*out, 1]      out_ref: [2*out, TB]
    """
    xt = xt_ref[...].astype(jnp.float32)                       # [D_in, TB]

    # hidden layer: relu(W0^T @ x^T + b0)                      -> [H, TB]
    h = jnp.dot(w0t_ref[...], xt, preferred_element_type=jnp.float32) + b0_ref[...]
    h = jnp.maximum(h, 0.0)

    # output layer: W1^T @ h + b1                              -> [2*n_outputs, TB]
    y = jnp.dot(w1t_ref[...], h, preferred_element_type=jnp.float32) + b1_ref[...]

    # Sublane-wise head selection (rows [0, n_outputs) -> mean, rest -> variance).
    # The mask is a single (2*n_outputs, 1) column broadcast by jnp.where.
    row = jax.lax.broadcasted_iota(jnp.int32, (y.shape[0], 1), 0)

    # stable softplus: identical to log(1 + exp(v)) but no overflow/underflow
    variance = jnp.maximum(y, 0.0) + jnp.log(1.0 + jnp.exp(-jnp.abs(y)))

    if use_tanh:
        mean = (jnp.tanh(y) + 1.0) * 0.5
    else:
        mean = y

    out_ref[...] = jnp.where(row < n_outputs, mean, variance).astype(out_ref.dtype)


def gaussian_mlp_forward(x, w0, b0, w1, b1, *, n_outputs, use_tanh=False, block_b=2048):
    """x: [B, inputs]; w0: [inputs, H]; b0: [1, H]; w1: [H, 2*outputs]; b1: [1, 2*outputs]."""
    B, D_in = x.shape
    H = w0.shape[1]
    D_out2 = w1.shape[1]
    assert D_out2 == 2 * n_outputs

    LANE = 128
    # Batch lives in the lane axis: tile must be a multiple of 128. Cap the tile so the
    # grid has >= 2 steps whenever B allows it (lets v7x use both TensorCores).
    Bp_min = pl.cdiv(B, LANE) * LANE
    if Bp_min >= 2 * LANE:
        tb_cap = (Bp_min // 2 // LANE) * LANE
    else:
        tb_cap = Bp_min
    TB = max(LANE, min(block_b, tb_cap))
    Bp = pl.cdiv(B, TB) * TB

    # Transposed operands (all tiny except x^T).
    xt = jnp.pad(x, ((0, Bp - B), (0, 0))).T          # [D_in, Bp]
    w0t = w0.T                                        # [H, D_in]
    b0c = b0.reshape(1, H).T                          # [H, 1]
    w1t = w1.T                                        # [2*outputs, H]
    b1c = b1.reshape(1, D_out2).T                     # [2*outputs, 1]

    kernel = functools.partial(gaussian_mlp_kernel,
                               n_outputs=n_outputs, use_tanh=use_tanh)

    out = pl.pallas_call(
        kernel,
        out_shape=jax.ShapeDtypeStruct((D_out2, Bp), jnp.float32),
        grid=(Bp // TB,),
        in_specs=[
            pl.BlockSpec((D_in, TB), lambda i: (0, i)),    # batch-tiled activations (lanes)
            pl.BlockSpec((H, D_in), lambda i: (0, 0)),     # weights stay VMEM-resident
            pl.BlockSpec((H, 1), lambda i: (0, 0)),
            pl.BlockSpec((D_out2, H), lambda i: (0, 0)),
            pl.BlockSpec((D_out2, 1), lambda i: (0, 0)),
        ],
        out_specs=pl.BlockSpec((D_out2, TB), lambda i: (0, i)),
        compiler_params=pltpu.CompilerParams(
            dimension_semantics=("parallel",),             # megacore sharding on v7x
            vmem_limit_bytes=32 * 1024 * 1024,             # safe on v5e/v6e/v7x for these tiles
        ),
    )(xt, w0t, b0c, w1t, b1c)

    out = out[:, :B]                                   # drop batch padding
    mean = out[:n_outputs, :].T                        # [B, outputs]
    variance = out[n_outputs:, :].T                    # [B, outputs]
    return mean, variance


def init_params(key, inputs, hidden, outputs):
    """Deterministic parameter init (uniform like nn.Linear defaults)."""
    k0, k1, k2, k3 = jax.random.split(key, 4)
    lim0 = 1.0 / jnp.sqrt(inputs)
    lim1 = 1.0 / jnp.sqrt(hidden)
    w0 = jax.random.uniform(k0, (inputs, hidden), jnp.float32, -lim0, lim0)
    b0 = jax.random.uniform(k1, (1, hidden), jnp.float32, -lim0, lim0)
    w1 = jax.random.uniform(k2, (hidden, 2 * outputs), jnp.float32, -lim1, lim1)
    b1 = jax.random.uniform(k3, (1, 2 * outputs), jnp.float32, -lim1, lim1)
    return w0, b0, w1, b1


def reference_forward(x, w0, b0, w1, b1, n_outputs, use_tanh=False):
    """Pure-JAX reference matching the PyTorch module exactly."""
    h = jnp.maximum(x @ w0 + b0, 0.0)
    y = h @ w1 + b1
    mean, variance = y[:, :n_outputs], y[:, n_outputs:]
    variance = jnp.log(1.0 + jnp.exp(variance))   # naive softplus, fine at these scales
    if use_tanh:
        mean = (jnp.tanh(mean) + 1.0) / 2.0
    return mean, variance


if __name__ == "__main__":
    # GaussianMLP(inputs=4, outputs=2, hidden_layers=[32], activation='relu', tanh=False)
    B, INPUTS, HIDDEN, OUTPUTS = 8, 4, 32, 2

    key = jax.random.PRNGKey(0)
    kx, kp, kx2 = jax.random.split(key, 3)
    x = jax.random.normal(kx, (B, INPUTS), jnp.float32)
    w0, b0, w1, b1 = init_params(kp, INPUTS, HIDDEN, OUTPUTS)

    mean, variance = gaussian_mlp_forward(x, w0, b0, w1, b1,
                                          n_outputs=OUTPUTS, use_tanh=False)
    jax.block_until_ready((mean, variance))

    ref_mean, ref_var = reference_forward(x, w0, b0, w1, b1, OUTPUTS, use_tanh=False)
    assert mean.shape == (B, OUTPUTS) and variance.shape == (B, OUTPUTS)
    assert jnp.allclose(mean, ref_mean, atol=1e-5, rtol=1e-5)
    assert jnp.allclose(variance, ref_var, atol=1e-5, rtol=1e-5)
    assert bool(jnp.all(variance > 0.0))

    # tanh-mean path (exercises the sublane-select epilogue with transcendentals on both heads)
    mean_t, var_t = gaussian_mlp_forward(x, w0, b0, w1, b1,
                                         n_outputs=OUTPUTS, use_tanh=True)
    ref_mean_t, ref_var_t = reference_forward(x, w0, b0, w1, b1, OUTPUTS, use_tanh=True)
    jax.block_until_ready((mean_t, var_t))
    assert jnp.allclose(mean_t, ref_mean_t, atol=1e-5, rtol=1e-5)
    assert jnp.allclose(var_t, ref_var_t, atol=1e-5, rtol=1e-5)

    # Larger, non-multiple-of-128 batch: exercises lane padding + a >=2-step grid.
    B2 = 200
    x2 = jax.random.normal(kx2, (B2, INPUTS), jnp.float32)
    mean2, var2 = gaussian_mlp_forward(x2, w0, b0, w1, b1,
                                       n_outputs=OUTPUTS, use_tanh=False)
    ref_mean2, ref_var2 = reference_forward(x2, w0, b0, w1, b1, OUTPUTS, use_tanh=False)
    jax.block_until_ready((mean2, var2))
    assert mean2.shape == (B2, OUTPUTS) and var2.shape == (B2, OUTPUTS)
    assert jnp.allclose(mean2, ref_mean2, atol=1e-5, rtol=1e-5)
    assert jnp.allclose(var2, ref_var2, atol=1e-5, rtol=1e-5)

    print("KERNEL_OK")
</pallas_src>

<mosaic_0001>
module attributes {stable_mosaic.version = 11 : i64} {
  func.func @gaussian_mlp_kernel(%arg0: i32, %arg1: memref<4x128xf32, #tpu.memory_space<vmem>>, %arg2: memref<32x4xf32, #tpu.memory_space<vmem>>, %arg3: memref<32x1xf32, #tpu.memory_space<vmem>>, %arg4: memref<4x32xf32, #tpu.memory_space<vmem>>, %arg5: memref<4x1xf32, #tpu.memory_space<vmem>>, %arg6: memref<4x128xf32, #tpu.memory_space<vmem>>) attributes {dimension_semantics = [#tpu.dimension_semantics<parallel>], iteration_bounds = array<i64: 1>, scalar_prefetch = 0 : i64, scratch_operands = 0 : i64, tpu.core_type = #tpu.core_type<tc>, window_params = [{transform_indices = @transform_0, window_bounds = array<i64: 4, 128>}, {pipeline_mode = #tpu.pipeline_mode<synchronous>, transform_indices = @transform_1, window_bounds = array<i64: 32, 4>}, {pipeline_mode = #tpu.pipeline_mode<synchronous>, transform_indices = @transform_2, window_bounds = array<i64: 32, 1>}, {pipeline_mode = #tpu.pipeline_mode<synchronous>, transform_indices = @transform_3, window_bounds = array<i64: 4, 32>}, {pipeline_mode = #tpu.pipeline_mode<synchronous>, transform_indices = @transform_4, window_bounds = array<i64: 4, 1>}, {transform_indices = @transform_5, window_bounds = array<i64: 4, 128>}]} {
    %c0 = arith.constant 0 : index
    %c0_0 = arith.constant 0 : index
    %0 = vector.load %arg1[%c0, %c0_0] : memref<4x128xf32, #tpu.memory_space<vmem>>, vector<4x128xf32>
    %c0_1 = arith.constant 0 : index
    %c0_2 = arith.constant 0 : index
    %1 = vector.load %arg2[%c0_1, %c0_2] : memref<32x4xf32, #tpu.memory_space<vmem>>, vector<32x4xf32>
    %cst = arith.constant dense<0.000000e+00> : vector<32x128xf32>
    %2 = tpu.matmul %1, %0, %cst {dimension_numbers = #tpu.dot_dimension_numbers<[1], [0], [0], [1], [0, 0, 1, 1], [], []>} : vector<32x4xf32>, vector<4x128xf32>, vector<32x128xf32> -> vector<32x128xf32>
    %c0_3 = arith.constant 0 : index
    %c0_4 = arith.constant 0 : index
    %3 = vector.load %arg3[%c0_3, %c0_4] : memref<32x1xf32, #tpu.memory_space<vmem>>, vector<32x1xf32>
    %4 = vector.broadcast %3 : vector<32x1xf32> to vector<32x128xf32>
    %5 = arith.addf %2, %4 : vector<32x128xf32>
    %cst_5 = arith.constant 0.000000e+00 : f32
    %6 = vector.broadcast %cst_5 : f32 to vector<32x128xf32>
    %7 = arith.maximumf %5, %6 : vector<32x128xf32>
    %c0_6 = arith.constant 0 : index
    %c0_7 = arith.constant 0 : index
    %8 = vector.load %arg4[%c0_6, %c0_7] : memref<4x32xf32, #tpu.memory_space<vmem>>, vector<4x32xf32>
    %cst_8 = arith.constant dense<0.000000e+00> : vector<4x128xf32>
    %9 = tpu.matmul %8, %7, %cst_8 {dimension_numbers = #tpu.dot_dimension_numbers<[1], [0], [0], [1], [0, 0, 1, 1], [], []>} : vector<4x32xf32>, vector<32x128xf32>, vector<4x128xf32> -> vector<4x128xf32>
    %c0_9 = arith.constant 0 : index
    %c0_10 = arith.constant 0 : index
    %10 = vector.load %arg5[%c0_9, %c0_10] : memref<4x1xf32, #tpu.memory_space<vmem>>, vector<4x1xf32>
    %11 = vector.broadcast %10 : vector<4x1xf32> to vector<4x128xf32>
    %12 = arith.addf %9, %11 : vector<4x128xf32>
    %13 = tpu.iota {dimensions = array<i32: 0>} : vector<4x1xi32>
    %cst_11 = arith.constant 0.000000e+00 : f32
    %14 = vector.broadcast %cst_11 : f32 to vector<4x128xf32>
    %15 = arith.maximumf %12, %14 : vector<4x128xf32>
    %16 = math.absf %12 : vector<4x128xf32>
    %cst_12 = arith.constant 0.000000e+00 : f32
    %17 = vector.broadcast %cst_12 : f32 to vector<4x128xf32>
    %18 = arith.subf %17, %16 : vector<4x128xf32>
    %19 = math.exp %18 : vector<4x128xf32>
    %cst_13 = arith.constant 1.000000e+00 : f32
    %20 = vector.broadcast %cst_13 : f32 to vector<4x128xf32>
    %21 = arith.addf %20, %19 : vector<4x128xf32>
    %22 = math.log %21 : vector<4x128xf32>
    %23 = arith.addf %15, %22 : vector<4x128xf32>
    %c2_i32 = arith.constant 2 : i32
    %24 = vector.broadcast %c2_i32 : i32 to vector<4x1xi32>
    %25 = arith.cmpi slt, %13, %24 : vector<4x1xi32>
    %26 = vector.shape_cast %25 : vector<4x1xi1> to vector<4x1xi1>
    %27 = vector.broadcast %26 : vector<4x1xi1> to vector<4x128xi1>
    %28 = arith.select %27, %12, %23 : vector<4x128xi1>, vector<4x128xf32>
    %c0_14 = arith.constant 0 : index
    %c0_15 = arith.constant 0 : index
    %29 = vector.load %arg6[%c0_14, %c0_15] : memref<4x128xf32, #tpu.memory_space<vmem>>, vector<4x128xf32>
    tpu.vector_store %arg6[%c0_14, %c0_15], %28 {strides = array<i32>} : memref<4x128xf32, #tpu.memory_space<vmem>>, vector<4x128xf32>,
    return
  }
  func.func @transform_0(%arg0: i32) -> (i32, i32) {
    %c0_i32 = arith.constant 0 : i32
    %c0_i32_0 = arith.constant 0 : i32
    return %c0_i32, %arg0 : i32, i32
  }
  func.func @transform_1(%arg0: i32) -> (i32, i32) {
    %c0_i32 = arith.constant 0 : i32
    %c0_i32_0 = arith.constant 0 : i32
    %c0_i32_1 = arith.constant 0 : i32
    return %c0_i32, %c0_i32_0 : i32, i32
  }
  func.func @transform_2(%arg0: i32) -> (i32, i32) {
    %c0_i32 = arith.constant 0 : i32
    %c0_i32_0 = arith.constant 0 : i32
    %c0_i32_1 = arith.constant 0 : i32
    return %c0_i32, %c0_i32_0 : i32, i32
  }
  func.func @transform_3(%arg0: i32) -> (i32, i32) {
    %c0_i32 = arith.constant 0 : i32
    %c0_i32_0 = arith.constant 0 : i32
    %c0_i32_1 = arith.constant 0 : i32
    return %c0_i32, %c0_i32_0 : i32, i32
  }
  func.func @transform_4(%arg0: i32) -> (i32, i32) {
    %c0_i32 = arith.constant 0 : i32
    %c0_i32_0 = arith.constant 0 : i32
    %c0_i32_1 = arith.constant 0 : i32
    return %c0_i32, %c0_i32_0 : i32, i32
  }
  func.func @transform_5(%arg0: i32) -> (i32, i32) {
    %c0_i32 = arith.constant 0 : i32
    %c0_i32_0 = arith.constant 0 : i32
    return %c0_i32, %arg0 : i32, i32
  }
}

</mosaic_0001>

<bundles_post_ra>
// kernel: tpu_custom_call.1
= control target key start
LH: loop header
LB: loop body
LE: loop exit
PB: predicated region body
PF: predicated region fallthrough
CT: control target
= control target key end

     0   :  { %vm63_vm0 = vcmask 1043456   ;;  %vm50_vm1 = vcmask 31744   ;;  %v343_v5 = vmov 0   ;;  %s427_s0 = inlined_call_operand.vmem [shape: f32[4,128], index: 0, kind: input, shape index: {}]   ;;  %s428_s1 = inlined_call_operand.vmem [shape: f32[32,4], index: 1, kind: input, shape index: {}]   ;;  %s429_s2 = inlined_call_operand.vmem [shape: f32[32,1], index: 2, kind: input, shape index: {}]   ;;  %s430_s3 = inlined_call_operand.vmem [shape: f32[4,32], index: 3, kind: input, shape index: {}]   ;;  %s431_s4 = inlined_call_operand.vmem [shape: f32[4,1], index: 4, kind: input, shape index: {}]   ;;  %s432_s5 = inlined_call_operand.hbm [shape: f32[4,128], index: 5, kind: output, shape index: {}]  }
   0x1   :  { %v21_v0 = vld [vmem:[%s427_s0] sm:$0xf]  ;;  %v23_v2 = vld [vmem:[%s428_s1 + $0x8] sm:$0xff]  ;;  %v24_v3 = vld [vmem:[%s428_s1 + $0x10] sm:$0xff]  ;;  %313 = vset.pattern.permute.xlu0 %v343_v5 }
   0x2   :  { %v22_v1 = vld [vmem:[%s428_s1] sm:$0xff]  ;;  %283 = vmatprep.subr.msk.mxu0 %vm63_vm0, %v21_v0  ;;  %v28_v6 = vld [vmem:[%s429_s2 + $0x10] sm:$0xff] }
   0x3   :  { %285 = vmatprep.mubr.msk.f32.mxu0 %vm50_vm1, %v22_v1  ;;  %v26_v4 = vld [vmem:[%s429_s2] sm:$0xff]  ;;  %284 = vmatpush3.msk.msra.mxu0 %vm63_vm0, %v21_v0 }
   0x4   :  { %286 = vmatmul.mubr.msk.f32.vlgmr.msra.gmra.mrb[0].mxu0 %vm50_vm1, %v23_v2  ;;  %32 = vperm.xlu0 %313, %v26_v4  }
   0x5   :  { %10 = vsyncpa [#allocation3], 0  ;;  %288 = vmatprep.mubr.msk.f32.mxu0 %vm50_vm1, %v24_v3  ;;  %v25_v7 = vld [vmem:[%s428_s1 + $0x18] sm:$0xff]  ;;  %v27_v8 = vld [vmem:[%s429_s2 + $0x8] sm:$0xff]  ;;  %314 = vset.pattern.permute.xlu1 %v343_v5  ;;  %v344_v11 = vmov 0.0|0.0   ;;  %vm345_vm2 = vmmov 0   ;;  %v237_v41 = vlaneseq }
   0x6   :  { %42 = vperm.xlu1 %314, %v28_v6   ;;  %v29_v9 = vld [vmem:[%s429_s2 + $0x18] sm:$0xff]  ;;  %v157_v10 = vld [vmem:[%s431_s4] sm:$0xf]  ;;  %302 = vmatprep.subr.bf16.mxu1 %v344_v11  ;;  %v346_v12 = vmov 0.0   ;;  %vm163_vm3 = vcmask 261120   ;;  %s347_s4 = smov [#allocation2]  }
   0x7   :  { %299 = vmatprep.mubr.msk.f32.mxu1 %vm345_vm2, %v346_v12  ;;  %v156_v31 = vld [vmem:[%s430_s3] sm:$0xf]  ;;  %v238_v42 = vshrl.u32 %v237_v41, 7  ;;  %s259_s3 = sshll.u32 %s347_s4, 4  ;;  %s260_s3 = int_to_ptr.vmem [resolvable:$true] %s259_s3 }
   0x8   :  { %289 = vmatmul.mubr.msk.f32.gmra.mrb[2].mxu0 %vm50_vm1, %v25_v7  ;;  %37 = vperm.xlu0 %313, %v27_v8   ;;  %s319_s12 = scalar_lea.vmem %s260_s3, 64  ;;  %p324_p1 = scmp.lt.s32.totalorder %s260_s3, %s260_s3 }
   0x9   :  { %vm248_vm4 = vcmp.lt.s32.totalorder %v238_v42, 2  ;;  %p320_p0 = scmp.ne.s32.totalorder %s260_s3, %s319_s12  ;;  %p325_p2 = scmp.lt.s32.totalorder %s319_s12, %s319_s12 }
   0xa   :  { %47 = vperm.xlu1 %314, %v29_v9  }
   0xb   :  { %p326_p3 = por %p325_p2, %p324_p1 }
   0xc   :  { %160 = vperm.xlu0 %313, %v157_v10  }
   0xd   :  { %p327_p4 = pnand %p326_p3, %p320_p0 }
  0x83   :  { %v33_v13 = vpop.permute.xlu0 %32 }
  0x85   :  { %v43_v14 = vpop.permute.xlu1 %42 }
  0x87   :  { %v38_v15 = vpop.permute.xlu0 %37 }
  0x89   :  { %v48_v21 = vpop.permute.xlu1 %47 }
  0x8b   :  { %v161_v32 = vpop.permute.xlu0 %160 }
  0xd7   :  { %v287_v16 = vpop.f32.mrb[0].mxu0 }
  0xd8   :  { %v139_v17 = vadd.f32 %v287_v16, %v38_v15  ;;  %v133_v18 = vpop.f32.mrb[1].mxu0 }
  0xd9   :  { %v134_v19 = vadd.f32 %v133_v18, %v33_v13 }
  0xda   :  { %v153_v20 = vmax.f32 %v139_v17, 0.0 }
  0xdb   :  { %v152_v22 = vmax.f32 %v134_v19, 0.0  ;;  %v290_v23 = vpop.f32.mrb[2].mxu0 }
  0xdc   :  { %v149_v24 = vadd.f32 %v290_v23, %v48_v21  ;;  %v143_v25 = vpop.f32.mrb[3].mxu0 }
  0xdd   :  { %v144_v26 = vadd.f32 %v143_v25, %v43_v14  ;;  %v303_v27 = vpack.c.bf16 %v153_v20, %v152_v22 }
  0xde   :  { %v155_v28 = vmax.f32 %v149_v24, 0.0 }
  0xdf   :  { %v154_v29 = vmax.f32 %v144_v26, 0.0  ;;  %304 = vmatpush3.bf16.msra.mxu1 %v303_v27 }
  0xe0   :  { %305 = vmatprep.subr.bf16.mxu1 %v344_v11 }
  0xe1   :  { %v306_v30 = vpack.c.bf16 %v155_v28, %v154_v29 }
  0xe3   :  { %307 = vmatpush3.bf16.msra.mxu1 %v306_v30 }
  0xe6   :  { %300 = vmatmul.mubr.msk.f32.vlgmr.msra.gmra.mrb[0].mxu1 %vm163_vm3, %v156_v31 }
 0x1b9   :  { %v233_v33 = vpop.f32.mrb[0].mxu1 }
 0x1ba   :  { %v234_v34 = vadd.f32 %v233_v33, %v161_v32  ;;  %v301_v35 = vpop.f32.mrb[1].mxu1 }
 0x1bc   :  { %v240_v36 = vand.u32 2147483647, %v234_v34  ;;  %v239_v44 = vmax.f32 %v234_v34, 0.0 }
 0x1be   :  { %v241_v37 = vsub.f32 0.0, %v240_v36 }
 0x1c0   :  { %v242_v38 = vmul.f32 1.442695, %v241_v37 }
 0x1c2   :  { %315 = vpow2.f32 %v242_v38 }
 0x1cc   :  { %v316_v39 = vpop.eup %315 }
 0x1cd   :  { %v244_v40 = vadd.f32 1.0, %v316_v39 }
 0x1cf   :  { %317 = vlog2.f32 %v244_v40 }
 0x1d9   :  { %v318_v43 = vpop.eup %317 }
 0x1da   :  { %v246_v45 = vmul.f32 0.6931472, %v318_v43 }
 0x1dc   :  { %v247_v46 = vadd.f32 %v246_v45, %v239_v44 }
 0x1de   :  { %v251_v47 = vsel %vm248_vm4, %v234_v34, %v247_v46 }
 0x1df   :  { %252 = vst [vmem:[#allocation2] sm:$0xf] %v251_v47 }
 0x1e0   :  { %330 = shalt.err (!%p327_p4)
}
 0x1e1   :  { %s331_s15 = scalar_lea.hbm %s432_s5, 64 }
 0x1e2   :  { %p332_p5 = scmp.ne.s32.totalorder %s432_s5, %s331_s15  ;;  %p335_p6 = scmp.lt.u32.totalorder %s331_s15, %s432_s5 }
 0x1e4   :  { %p337_p7 = pnand %p335_p6, %p332_p5 }
 0x1e6   :  { %340 = shalt.err (!%p337_p7)
}
 0x1e7   :  { %262 = dma.vmem_to_hbm [thread:$0]  %s260_s3, 64, %s432_s5, [#allocation3]  }
 0x1e8   :  { %341 = dma.done.wait [#allocation3], 64  }
 0x1e9   :  { %342 = vsyncadd [#allocation3], 4294967232 }
 0x1ea   :  { %266 = vsyncpa [#allocation3], 1 }

</bundles_post_ra>
